<compile_context>
chip_gen: v5e
topology: v5e:2x2
jax: 0.10.0
libtpu: 0.0.40
codegen_flags: <defaults>
</compile_context>

<pallas_src>
import functools

import numpy as np
import jax
import jax.numpy as jnp
from jax.experimental import pallas as pl
from jax.experimental.pallas import tpu as pltpu

_LANE = 128


def build_pe_table(d_model: int, max_seq_len: int) -> jnp.ndarray:
    """Deterministic parameter setup, identical formula to the PyTorch __init__."""
    pos = np.arange(max_seq_len, dtype=np.float64)[:, None]          # (L, 1)
    j = np.arange(d_model, dtype=np.float64)[None, :]                # (1, D)
    angle = pos / np.power(10000.0, 2.0 * np.floor(j / 2.0) / d_model)
    pe = np.zeros((max_seq_len, d_model), dtype=np.float64)
    pe[:, 0::2] = np.sin(angle[:, 0::2])
    pe[:, 1::2] = np.cos(angle[:, 1::2])
    pad_row = np.zeros((1, d_model), dtype=np.float64)
    table = np.concatenate([pad_row, pe], axis=0)                    # (L+1, D)
    return jnp.asarray(table, dtype=jnp.float32)


def _pe_kernel(len_ref, table_ref, out_ref, *, d_model, tile_ld):
    # len_ref:   VMEM (Bt, 1)  int32 -- per-row sequence lengths for this batch tile
    # table_ref: VMEM (1, T)   f32   -- PE_table[1:max_len+1] flattened, tile j
    # out_ref:   VMEM (Bt, T)  f32   -- lane-dense flattened output tile
    base = pl.program_id(1) * tile_ld                                # global column offset
    thresh = len_ref[...] * d_model                                  # (Bt, 1) i32
    col = base + jax.lax.broadcasted_iota(jnp.int32, out_ref.shape, 1)
    # col < len_b*d_model  <=>  (col // d_model) < len_b, i.e. row t is within the length.
    out_ref[...] = jnp.where(col < thresh, table_ref[...], 0.0)


def _choose_tiles(B: int, LD: int):
    """Pick (batch_tile, ld_tile) so blocks stay small on v5e/v6e/v7x VMEM."""
    out_block_budget = 6 << 20                       # bytes per output block (x2 buffers)
    # Batch tile: whole batch if tiny, otherwise a multiple of 8.
    if B <= 8:
        bt = B
    else:
        max_rows = out_block_budget // max(LD * 4, 1)
        bt = int(max(8, min(B, (max_rows // 8) * 8)))
    # LD tile: full extent if it fits the per-row budget, else a multiple of 128 lanes.
    per_row_elems = out_block_budget // (4 * max(bt, 1))
    if LD <= per_row_elems:
        tile_ld = LD
    else:
        tile_ld = int(max(_LANE, (per_row_elems // _LANE) * _LANE))
    # v7x megacore: give the "parallel" grid >= 2 steps when it costs nothing
    # (split LD in half only if both halves stay 128-lane aligned).
    if pl.cdiv(B, bt) * pl.cdiv(LD, tile_ld) < 2 and tile_ld == LD and LD % (2 * _LANE) == 0:
        tile_ld = LD // 2
    return bt, tile_ld


def positional_encoding(input_len, pe_table: jnp.ndarray, max_len: int | None = None):
    """input_len: (B,) int lengths. Returns (B, max_len, d_model) float32.

    Pass `max_len` explicitly (ideally bucketed to a few values) to avoid the host sync
    used to resolve the data-dependent output shape and to bound Mosaic recompiles.
    """
    input_len = jnp.asarray(input_len, dtype=jnp.int32)
    B = int(input_len.shape[0])
    d_model = int(pe_table.shape[1])

    if max_len is None:
        # One-time host read only to resolve the data-dependent OUTPUT SHAPE
        # (equivalent of torch.max(input_len)).
        max_len = int(jax.device_get(jnp.max(input_len)))
    if max_len < 1:
        raise ValueError("max(input_len) must be >= 1")
    if max_len + 1 > pe_table.shape[0]:
        raise ValueError("an input length exceeds the table's max_seq_len")

    LD = max_len * d_model

    # Lane-dense flattened views (row-major, layout-preserving reshapes).
    table_flat = pe_table[1:max_len + 1, :].reshape(1, LD)           # (1, L*D) f32
    lens_2d = input_len.reshape(B, 1)                                # (B, 1)   i32

    bt, tile_ld = _choose_tiles(B, LD)
    grid = (pl.cdiv(B, bt), pl.cdiv(LD, tile_ld))

    # Explicit VMEM budget from the chosen blocks (output + table, double-buffered).
    need = 2 * (bt * tile_ld * 4) + 2 * (tile_ld * 4) + (1 << 20)
    vmem_limit = int(min(max(2 * need, 16 << 20), 32 << 20))

    kernel = functools.partial(_pe_kernel, d_model=d_model, tile_ld=tile_ld)

    out_flat = pl.pallas_call(
        kernel,
        out_shape=jax.ShapeDtypeStruct((B, LD), jnp.float32),
        grid=grid,
        in_specs=[
            pl.BlockSpec((bt, 1), lambda i, j: (i, 0)),        # lengths for batch tile i
            pl.BlockSpec((1, tile_ld), lambda i, j: (0, j)),   # PE table slice, LD tile j
        ],
        out_specs=pl.BlockSpec((bt, tile_ld), lambda i, j: (i, j)),
        compiler_params=pltpu.CompilerParams(
            dimension_semantics=("parallel", "parallel"),
            vmem_limit_bytes=vmem_limit),
        cost_estimate=pl.CostEstimate(
            flops=0, transcendentals=0,
            bytes_accessed=int(B * LD * 4 + LD * 4 + B * 4)),
    )(lens_2d, table_flat)

    # Row-major split of the last dim -> free reshape back to (B, max_len, d_model).
    return out_flat.reshape(B, max_len, d_model)


if __name__ == "__main__":
    d_model = 32
    max_seq_len = 16
    batch = 4

    key = jax.random.PRNGKey(0)
    # deterministic example lengths in [1, max_seq_len]
    input_len = jax.random.randint(key, (batch,), 1, max_seq_len + 1, dtype=jnp.int32)

    pe_table = build_pe_table(d_model, max_seq_len)

    out = positional_encoding(input_len, pe_table)
    out = jax.block_until_ready(out)

    # Pure-JAX/NumPy reference check (same semantics as the PyTorch forward).
    lens = np.asarray(jax.device_get(input_len))
    max_len = int(lens.max())
    tbl = np.asarray(jax.device_get(pe_table))
    input_pos = np.stack(
        [np.concatenate([np.arange(1, l + 1), np.zeros(max_len - l, dtype=np.int64)])
         for l in lens]).astype(np.int64)
    ref = tbl[input_pos]                                             # (B, max_len, d_model)
    np.testing.assert_allclose(np.asarray(jax.device_get(out)), ref, rtol=1e-6, atol=1e-6)

    print("KERNEL_OK")
</pallas_src>

<mosaic_0001>
module attributes {stable_mosaic.version = 11 : i64} {
  func.func @_pe_kernel(%arg0: i32, %arg1: i32, %arg2: memref<4x1xi32, #tpu.memory_space<vmem>>, %arg3: memref<1x448xf32, #tpu.memory_space<vmem>>, %arg4: memref<4x448xf32, #tpu.memory_space<vmem>>) attributes {dimension_semantics = [#tpu.dimension_semantics<parallel>, #tpu.dimension_semantics<parallel>], iteration_bounds = array<i64: 1, 1>, scalar_prefetch = 0 : i64, scratch_operands = 0 : i64, tpu.core_type = #tpu.core_type<tc>, window_params = [{transform_indices = @transform_0, window_bounds = array<i64: 4, 1>}, {transform_indices = @transform_1, window_bounds = array<i64: 1, 448>}, {transform_indices = @transform_2, window_bounds = array<i64: 4, 448>}]} {
    %c448_i32 = arith.constant 448 : i32
    %0 = arith.muli %arg1, %c448_i32 : i32
    %c0 = arith.constant 0 : index
    %c0_0 = arith.constant 0 : index
    %1 = vector.load %arg2[%c0, %c0_0] : memref<4x1xi32, #tpu.memory_space<vmem>>, vector<4x1xi32>
    %c32_i32 = arith.constant 32 : i32
    %2 = vector.broadcast %c32_i32 : i32 to vector<4x1xi32>
    %3 = arith.muli %1, %2 : vector<4x1xi32>
    %4 = tpu.iota {dimensions = array<i32: 1>} : vector<4x448xi32>
    %5 = vector.broadcast %0 : i32 to vector<4x448xi32>
    %6 = arith.addi %5, %4 : vector<4x448xi32>
    %7 = vector.broadcast %3 : vector<4x1xi32> to vector<4x448xi32>
    %8 = arith.cmpi slt, %6, %7 : vector<4x448xi32>
    %c0_1 = arith.constant 0 : index
    %c0_2 = arith.constant 0 : index
    %9 = vector.load %arg3[%c0_1, %c0_2] : memref<1x448xf32, #tpu.memory_space<vmem>>, vector<1x448xf32>
    %cst = arith.constant 0.000000e+00 : f32
    %10 = vector.shape_cast %9 : vector<1x448xf32> to vector<1x448xf32>
    %11 = vector.broadcast %10 : vector<1x448xf32> to vector<4x448xf32>
    %12 = vector.broadcast %cst : f32 to vector<4x448xf32>
    %13 = arith.select %8, %11, %12 : vector<4x448xi1>, vector<4x448xf32>
    %c0_3 = arith.constant 0 : index
    %c0_4 = arith.constant 0 : index
    %14 = vector.load %arg4[%c0_3, %c0_4] : memref<4x448xf32, #tpu.memory_space<vmem>>, vector<4x448xf32>
    tpu.vector_store %arg4[%c0_3, %c0_4], %13 {strides = array<i32>} : memref<4x448xf32, #tpu.memory_space<vmem>>, vector<4x448xf32>,
    return
  }
  func.func @transform_0(%arg0: i32, %arg1: i32) -> (i32, i32) {
    %c0_i32 = arith.constant 0 : i32
    %c0_i32_0 = arith.constant 0 : i32
    return %arg0, %c0_i32 : i32, i32
  }
  func.func @transform_1(%arg0: i32, %arg1: i32) -> (i32, i32) {
    %c0_i32 = arith.constant 0 : i32
    %c0_i32_0 = arith.constant 0 : i32
    return %c0_i32, %arg1 : i32, i32
  }
  func.func @transform_2(%arg0: i32, %arg1: i32) -> (i32, i32) {
    %c0_i32 = arith.constant 0 : i32
    return %arg0, %arg1 : i32, i32
  }
}

</mosaic_0001>

<bundles_post_ra>
// kernel: tpu_custom_call.1
= control target key start
LH: loop header
LB: loop body
LE: loop exit
PB: predicated region body
PF: predicated region fallthrough
CT: control target
= control target key end

     0   :  { %v106_v1 = vmov 0   ;;  %s135_s0 = inlined_call_operand.vmem [shape: s32[4,1], index: 0, kind: input, shape index: {}]   ;;  %s136_s1 = inlined_call_operand.vmem [shape: f32[1,448], index: 1, kind: input, shape index: {}]   ;;  %s137_s2 = inlined_call_operand.hbm [shape: f32[4,448], index: 2, kind: output, shape index: {}]  }
   0x1   :  { %v13_v0 = vld [vmem:[%s135_s0] sm:$0xf]  ;;  %79 = vset.pattern.permute.xlu0 %v106_v1 }
   0x2   :  { %v14_v2 = vmul.u32 32, %v13_v0 }
   0x3   :  { %7 = vsyncpa [#allocation3], 0  ;;  %v15_v3 = vlaneseq  ;;  %v32_v5 = vld [vmem:[%s136_s1] sm:$0xf]  ;;  %vm52_vm0 = vcmask 1043456   ;;  %vm58_vm1 = vcmask 523268  }
   0x4   :  { %26 = vperm.xlu0 %79, %v14_v2   ;;  %v35_v9 = vperm.slane %v32_v5, 1  ;;  %v37_v10 = vperm.slane %v32_v5, 3  ;;  %v34_v11 = vperm.slane %v32_v5, 0  ;;  %v36_v12 = vperm.slane %v32_v5, 2  ;;  %s107_s0 = smov [#allocation2]   ;;  %s68_s15 = sshll.u32 %s137_s2, 4  ;;  %vm59_vm6 = vmor %vm58_vm1, %vm52_vm0  ;;  %s69_s15 = int_to_ptr.hbm [resolvable:$true] %s68_s15 }
   0x5   :  { %v16_v4 = vand.u32 127, %v15_v3  ;;  %s66_s13 = sshll.u32 %s107_s0, 4  ;;  %s67_s13 = int_to_ptr.vmem [resolvable:$true] %s66_s13 }
   0x7   :  { %v17_v6 = vadd.s32 128, %v16_v4  ;;  %v18_v7 = vadd.s32 256, %v16_v4  ;;  %v19_v8 = vadd.s32 384, %v16_v4 }
  0x76   :  { %v27_v13 = vpop.permute.xlu0 %26 }
  0x77   :  { %vm28_vm2 = vcmp.lt.s32.totalorder %v16_v4, %v27_v13  ;;  %vm29_vm3 = vcmp.lt.s32.totalorder %v17_v6, %v27_v13  ;;  %vm30_vm4 = vcmp.lt.s32.totalorder %v18_v7, %v27_v13  ;;  %vm31_vm5 = vcmp.lt.s32.totalorder %v19_v8, %v27_v13 }
  0x78   :  { %v43_v14 = vsel %vm29_vm3, %v35_v9, 0.0  ;;  %v45_v15 = vsel %vm31_vm5, %v37_v10, 0.0  ;;  %v42_v18 = vsel %vm28_vm2, %v34_v11, 0.0  ;;  %v44_v19 = vsel %vm30_vm4, %v36_v12, 0.0 }
  0x79   :  { %v50_v16 = vrot.slane %v43_v14, 4  ;;  %v51_v17 = vrot.slane %v45_v15, 4 }
  0x7b   :  { %v53_v20 = vsel %vm52_vm0, %v42_v18, %v50_v16  ;;  %v54_v21 = vsel %vm52_vm0, %v44_v19, %v51_v17 }
  0x7c   :  { %57 = vst [vmem:[#allocation2] sm:$0xff] %v53_v20 }
  0x7d   :  { %60 = vst.msk [vmem:[#allocation2 + $0x8] sm:$0xff] %vm59_vm6, %v54_v21 }
  0x7e   :  { %71 = dma.vmem_to_hbm [thread:$0]  %s67_s13, 256, %s69_s15, [#allocation3]  }
  0x7f   :  { %104 = dma.done.wait [#allocation3], 256  }
  0x80   :  { %105 = vsyncadd [#allocation3], 4294967040 }
  0x81   :  { %76 = vsyncpa [#allocation3], 1 }

</bundles_post_ra>
